<compile_context>
chip_gen: v7x
topology: tpu7x:2x2x1
jax: 0.10.0
libtpu: 0.0.40
codegen_flags: <defaults>
</compile_context>

<pallas_src>
import math

import jax
import jax.numpy as jnp
from jax.experimental import pallas as pl
from jax.experimental.pallas import tpu as pltpu


_TARGET_TILE_BYTES = 8 * 1024 * 1024          # per input buffer
_VMEM_CAP_BYTES = 48 * 1024 * 1024            # stay under v7x 64 MiB/TC physical


def _sublane(itemsize):
    # Native sublane packing per 32-bit word: f32 -> 8, bf16 -> 16, int8/fp8 -> 32.
    return {4: 8, 2: 16, 1: 32}.get(int(itemsize), 8)


def _lane_pad(n):
    return ((n + 127) // 128) * 128


# --------------------------------------------------------------------------- #
# Kernel 1: row mean of a (B, N) array (reduce last axis).
# --------------------------------------------------------------------------- #
def _make_row_mean_kernel(n):
    inv_n = 1.0 / float(n)

    def kernel(x_ref, m_ref):
        x = x_ref[...].astype(jnp.float32)                       # (tile_b, N)
        m_ref[...] = jnp.sum(x, axis=1, keepdims=True) * inv_n   # (tile_b, 1)

    return kernel


def _row_mean_pallas(x2, tile_b=None):
    """(B, N) -> per-row mean, shape (B,), float32."""
    B, N = x2.shape
    itemsize = jnp.dtype(x2.dtype).itemsize
    sub = _sublane(itemsize)
    lane_padded = _lane_pad(N)

    if tile_b is None:
        tile_b = _TARGET_TILE_BYTES // max(1, lane_padded * itemsize)
    tile_b = max(sub, (int(tile_b) // sub) * sub)

    if B <= tile_b:
        total_bytes = B * lane_padded * itemsize
        if total_bytes > (4 << 20) and B >= 4 * sub:
            # Keep >=4 grid steps: megacore split on v7x + DMA/compute overlap.
            tile_b = max(sub, (((B + 3) // 4) // sub) * sub)
        else:
            tile_b = B                     # single full-extent block (always legal)

    grid = (pl.cdiv(B, tile_b),)

    tile_bytes = tile_b * lane_padded * itemsize
    # double-buffered input + f32 widening temp + slack
    vmem_limit = int(min(_VMEM_CAP_BYTES,
                         max(16 << 20,
                             2 * tile_bytes + tile_b * lane_padded * 4 + (2 << 20))))

    mean = pl.pallas_call(
        _make_row_mean_kernel(N),
        out_shape=jax.ShapeDtypeStruct((B, 1), jnp.float32),
        grid=grid,
        in_specs=[pl.BlockSpec((tile_b, N), lambda i: (i, 0))],
        out_specs=pl.BlockSpec((tile_b, 1), lambda i: (i, 0)),
        compiler_params=pltpu.CompilerParams(
            dimension_semantics=("parallel",),
            vmem_limit_bytes=vmem_limit),
        cost_estimate=pl.CostEstimate(
            flops=int(B) * int(N),
            transcendentals=0,
            bytes_accessed=int(B) * int(N) * int(itemsize) + int(B) * 4),
    )(x2)
    return mean[:, 0]


# --------------------------------------------------------------------------- #
# Kernel 2: mean over axis 1 of a (d0, N, T) array in native layout (no transpose).
# --------------------------------------------------------------------------- #
def _make_axis1_mean_kernel(n):
    inv_n = 1.0 / float(n)

    def kernel(x_ref, m_ref):
        x = x_ref[...].astype(jnp.float32)          # (tile_d0, N, tile_t)
        m_ref[...] = jnp.sum(x, axis=1) * inv_n     # (tile_d0, tile_t) lane-dense

    return kernel


def _axis1_mean_pallas(x3):
    """(d0, N, T) -> mean over axis 1, shape (d0, T), float32.

    Returns None if a legal tiling within the VMEM budget is not possible
    (caller falls back to the transpose path)."""
    d0, N, T = x3.shape
    itemsize = jnp.dtype(x3.dtype).itemsize

    # Lane-axis tile.
    if T <= 128:
        tile_t = T
    else:
        by_budget = _TARGET_TILE_BYTES // max(1, N * itemsize)
        tile_t = max(128, (by_budget // 128) * 128)
        if tile_t >= T:
            tile_t = T

    lane_pad_t = _lane_pad(tile_t)
    per_row_bytes = N * lane_pad_t * itemsize
    tile_d0 = max(1, _TARGET_TILE_BYTES // max(1, per_row_bytes))
    if tile_d0 >= d0:
        tile_d0 = d0                               # full dim -> always legal
    else:
        tile_d0 = (tile_d0 // 8) * 8               # output sublane alignment
        if tile_d0 < 8:
            return None                            # per-row slab too big; fall back

    grid = (pl.cdiv(d0, tile_d0), pl.cdiv(T, tile_t))

    tile_bytes = tile_d0 * N * lane_pad_t * itemsize
    vmem_limit = int(min(_VMEM_CAP_BYTES,
                         max(16 << 20,
                             2 * tile_bytes + tile_d0 * N * lane_pad_t * 4 + (2 << 20))))

    mean = pl.pallas_call(
        _make_axis1_mean_kernel(N),
        out_shape=jax.ShapeDtypeStruct((d0, T), jnp.float32),
        grid=grid,
        in_specs=[pl.BlockSpec((tile_d0, N, tile_t), lambda i, j: (i, 0, j))],
        out_specs=pl.BlockSpec((tile_d0, tile_t), lambda i, j: (i, j)),
        compiler_params=pltpu.CompilerParams(
            dimension_semantics=("parallel", "parallel"),
            vmem_limit_bytes=vmem_limit),
        cost_estimate=pl.CostEstimate(
            flops=int(d0) * int(N) * int(T),
            transcendentals=0,
            bytes_accessed=int(d0) * int(N) * int(T) * int(itemsize)
                           + int(d0) * int(T) * 4),
    )(x3)
    return mean


# --------------------------------------------------------------------------- #
# Wrapper: EntropyLoss forward.
# --------------------------------------------------------------------------- #
def entropy_loss_pallas(entropy, eta, target_entropy, tile_b=None):
    """Return (dual_loss, reg_loss) matching the PyTorch forward shapes (float32)."""
    eta = float(eta)
    target_entropy = float(target_entropy)
    x = jnp.asarray(entropy)

    def _from_mean(m):
        # detach on (entropy - target): gradient only flows to eta (a constant here).
        dual = jax.lax.stop_gradient(eta * m - eta * target_entropy)
        reg = -eta * m
        return dual, reg

    # --- Degenerate shapes: no reduction to fuse -> plain XLA ops (no kernel). ---
    if x.ndim <= 1:
        xf = x.astype(jnp.float32)
        dual = jax.lax.stop_gradient(eta * (xf - target_entropy))
        reg = -eta * xf
        return dual, reg

    if x.ndim == 2:
        B, N = x.shape
        if N == 1:
            return _from_mean(x[:, 0].astype(jnp.float32))
        return _from_mean(_row_mean_pallas(x, tile_b))

    # --- ndim > 2: reduce axis 1 in native layout (contiguous reshape, no transpose). ---
    d0, N = x.shape[0], x.shape[1]
    trailing = x.shape[2:]
    T = int(math.prod(trailing))
    x3 = x.reshape(d0, N, T)
    m = _axis1_mean_pallas(x3)
    if m is None:
        # TODO(synk): extreme per-row slabs (huge N*T) fall back to a transpose pass.
        xt = jnp.moveaxis(x, 1, -1).reshape(-1, N)
        m = _row_mean_pallas(xt, tile_b).reshape((d0,) + trailing)
    else:
        m = m.reshape((d0,) + trailing)
    return _from_mean(m)


class EntropyLoss:
    """JAX/Pallas port of rllib EntropyLoss (forward only)."""

    def __init__(self, eta=0.0, target_entropy=0.0, regularization=True):
        self.target_entropy = float(target_entropy)
        self.regularization = bool(regularization)
        # Forward only needs the current scalar value of eta in both modes
        # (Constant(eta)() == eta; Learnable(eta)() initialises to eta).
        # TODO(synk): ParameterDecay / Learnable schedules update eta between
        # calls; here eta is a fixed compile-time constant per module instance,
        # and the kernel has no custom VJP (forward-only).
        self.eta = float(eta)

    def __call__(self, entropy):
        if self.target_entropy == 0.0 and (not self.regularization):
            # torch returns Loss() -> scalar zero losses.
            z = jnp.zeros((), jnp.float32)
            return {"dual_loss": z, "reg_loss": z}
        dual, reg = entropy_loss_pallas(entropy, self.eta, self.target_entropy)
        return {"dual_loss": dual, "reg_loss": reg}


# --------------------------------------------------------------------------- #
# Reference + tests
# --------------------------------------------------------------------------- #
def _reference(entropy, eta, target_entropy):
    e = jnp.asarray(entropy, jnp.float32)
    dual = eta * (e - target_entropy)
    reg = -eta * e
    if dual.ndim > 1:
        dual = dual.mean(axis=1)
        reg = reg.mean(axis=1)
    return dual, reg


if __name__ == "__main__":
    key = jax.random.PRNGKey(0)
    k1, k2, k3, k4 = jax.random.split(key, 4)

    eta = 0.5
    target_entropy = -2.0
    module = EntropyLoss(eta=eta, target_entropy=target_entropy, regularization=True)

    # Case 1: small 2-D f32 (B, N) = (4, 32), single-block path.
    ent = jax.random.normal(k1, (4, 32), dtype=jnp.float32)
    out = module(ent)
    dual = jax.block_until_ready(out["dual_loss"])
    reg = jax.block_until_ready(out["reg_loss"])
    rd, rr = _reference(ent, eta, target_entropy)
    assert dual.shape == (4,) and reg.shape == (4,)
    assert jnp.allclose(dual, rd, atol=1e-5, rtol=1e-5)
    assert jnp.allclose(reg, rr, atol=1e-5, rtol=1e-5)

    # Case 2: bf16 input (kept bf16 in HBM, widened to f32 inside the kernel),
    # tile rows snap to the bf16 (16,128) sublane packing.
    ent_bf16 = jax.random.normal(k2, (16, 64), dtype=jnp.float32).astype(jnp.bfloat16)
    d2, r2 = entropy_loss_pallas(ent_bf16, eta, target_entropy)
    d2 = jax.block_until_ready(d2)
    rd2, rr2 = _reference(ent_bf16.astype(jnp.float32), eta, target_entropy)
    assert jnp.allclose(d2, rd2, atol=1e-4, rtol=1e-4)
    assert jnp.allclose(r2, rr2, atol=1e-4, rtol=1e-4)

    # Case 3: multi-step grid with a ragged last block (B=20, tile_b=8 -> grid 3,
    # last block partial, NO input padding copy).
    ent3 = jax.random.normal(k3, (20, 128), dtype=jnp.float32)
    d3, r3 = entropy_loss_pallas(ent3, eta, target_entropy, tile_b=8)
    d3 = jax.block_until_ready(d3)
    rd3, rr3 = _reference(ent3, eta, target_entropy)
    assert d3.shape == (20,) and r3.shape == (20,)
    assert jnp.allclose(d3, rd3, atol=1e-5, rtol=1e-5)
    assert jnp.allclose(r3, rr3, atol=1e-5, rtol=1e-5)

    # Case 4: ndim > 2 native-layout axis-1 reduction (no moveaxis/transpose pass).
    ent4 = jax.random.normal(k4, (2, 4, 16, 16), dtype=jnp.float32)
    d4, r4 = entropy_loss_pallas(ent4, eta, target_entropy)
    d4 = jax.block_until_ready(d4)
    rd4, rr4 = _reference(ent4, eta, target_entropy)
    assert d4.shape == (2, 16, 16) and r4.shape == (2, 16, 16)
    assert jnp.allclose(d4, rd4, atol=1e-5, rtol=1e-5)
    assert jnp.allclose(r4, rr4, atol=1e-5, rtol=1e-5)

    # Case 5: ndim == 1 and scalar bypass (no reduction in torch either).
    ent5 = jax.random.normal(k1, (8,), dtype=jnp.float32)
    d5, r5 = entropy_loss_pallas(ent5, eta, target_entropy)
    rd5, rr5 = _reference(ent5, eta, target_entropy)
    assert d5.shape == (8,)
    assert jnp.allclose(jax.block_until_ready(d5), rd5, atol=1e-6)
    assert jnp.allclose(r5, rr5, atol=1e-6)
    d6, r6 = entropy_loss_pallas(jnp.float32(1.25), eta, target_entropy)
    assert d6.shape == () and r6.shape == ()
    assert jnp.allclose(jax.block_until_ready(d6), eta * (1.25 - target_entropy), atol=1e-6)

    print("KERNEL_OK")
</pallas_src>

<mosaic_0001>
module attributes {stable_mosaic.version = 11 : i64} {
  func.func @kernel(%arg0: i32, %arg1: memref<4x32xf32, #tpu.memory_space<vmem>>, %arg2: memref<4x1xf32, #tpu.memory_space<vmem>>) attributes {dimension_semantics = [#tpu.dimension_semantics<parallel>], iteration_bounds = array<i64: 1>, scalar_prefetch = 0 : i64, scratch_operands = 0 : i64, tpu.core_type = #tpu.core_type<tc>, window_params = [{transform_indices = @transform_0, window_bounds = array<i64: 4, 32>}, {transform_indices = @transform_1, window_bounds = array<i64: 4, 1>}]} {
    %c0 = arith.constant 0 : index
    %c0_0 = arith.constant 0 : index
    %0 = vector.load %arg1[%c0, %c0_0] : memref<4x32xf32, #tpu.memory_space<vmem>>, vector<4x32xf32>
    %cst = arith.constant dense<0.000000e+00> : vector<4xf32>
    %1 = vector.multi_reduction <add>, %0, %cst [1] : vector<4x32xf32> to vector<4xf32>
    %2 = vector.shape_cast %1 : vector<4xf32> to vector<4x1xf32>
    %cst_1 = arith.constant 3.125000e-02 : f32
    %3 = vector.broadcast %cst_1 : f32 to vector<4x1xf32>
    %4 = arith.mulf %2, %3 : vector<4x1xf32>
    %c0_2 = arith.constant 0 : index
    %c0_3 = arith.constant 0 : index
    %5 = vector.load %arg2[%c0_2, %c0_3] : memref<4x1xf32, #tpu.memory_space<vmem>>, vector<4x1xf32>
    tpu.vector_store %arg2[%c0_2, %c0_3], %4 {strides = array<i32>} : memref<4x1xf32, #tpu.memory_space<vmem>>, vector<4x1xf32>,
    return
  }
  func.func @transform_0(%arg0: i32) -> (i32, i32) {
    %c0_i32 = arith.constant 0 : i32
    %c0_i32_0 = arith.constant 0 : i32
    return %arg0, %c0_i32 : i32, i32
  }
  func.func @transform_1(%arg0: i32) -> (i32, i32) {
    %c0_i32 = arith.constant 0 : i32
    %c0_i32_0 = arith.constant 0 : i32
    return %arg0, %c0_i32 : i32, i32
  }
}

</mosaic_0001>

<bundles_post_ra>
// kernel: tpu_custom_call.1
= control target key start
LH: loop header
LB: loop body
LE: loop exit
PB: predicated region body
PF: predicated region fallthrough
CT: control target
= control target key end

     0   :  { %6 = vsyncpa [#allocation3], 0  ;;  %s58_s6 = smov [#allocation2]   ;;  %s84_s0 = inlined_call_operand.hbm [shape: f32[4,32], index: 0, kind: input, shape index: {}]   ;;  %s85_s1 = inlined_call_operand.vmem [shape: f32[4,1], index: 1, kind: output, shape index: {}]  }
   0x1   :  { %s13_s7 = sshll.u32 %s58_s6, 4  ;;  %s34_s10 = scalar_lea.hbm %s84_s0, 64  ;;  %s14_s7 = int_to_ptr.vmem [resolvable:$true] %s13_s7 }
   0x2   :  { %p35_p0 = scmp.ne.s32.totalorder %s84_s0, %s34_s10  ;;  %p38_p1 = scmp.lt.u32.totalorder %s34_s10, %s84_s0 }
   0x4   :  { %p40_p2 = pnand %p38_p1, %p35_p0 }
   0x6   :  { %43 = shalt.err (!%p40_p2)
}
   0x7   :  { %s44_s15 = scalar_lea.vmem %s14_s7, 64  ;;  %p49_p4 = scmp.lt.s32.totalorder %s14_s7, %s14_s7 }
   0x8   :  { %p45_p3 = scmp.ne.s32.totalorder %s14_s7, %s44_s15  ;;  %p50_p5 = scmp.lt.s32.totalorder %s44_s15, %s44_s15 }
   0xa   :  { %p51_p6 = por %p50_p5, %p49_p4 }
   0xc   :  { %p52_p7 = pnand %p51_p6, %p45_p3 }
   0xe   :  { %55 = shalt.err (!%p52_p7)
}
   0xf   :  { %16 = dma.hbm_to_vmem [thread:$0]  %s84_s0, 64, %s14_s7, [#allocation3]  }
  0x10   :  { %56 = dma.done.wait [#allocation3], 64  }
  0x11   :  { %57 = vsyncadd [#allocation3], 4294967232  ;;  %vm21_vm0 = vcmask 257024   ;;  %v20_v0 = vld [vmem:[#allocation2] sm:$0xf]  ;;  %vm26_vm1 = vcmask 3072  }
  0x12   :  { %v22_v1 = vsel %vm21_vm0, %v20_v0, 0.0 }
  0x13   :  { %23 = vadd.xlane.f32.xlu0 %v22_v1 }
  0xa0   :  { %v24_v2 = vpop.xlane.xlu0 %23 }
  0xa1   :  { %v25_v3 = vmul.f32 0.03125, %v24_v2 }
  0xa3   :  { %27 = vst.msk [vmem:[%s85_s1] sm:$0xf] %vm26_vm1, %v25_v3 }
  0xa4   :  { %32 = vsyncpa [#allocation3], 1 }

</bundles_post_ra>
